<compile_context>
chip_gen: v6e
topology: v6e:2x2x1
jax: 0.10.0
libtpu: 0.0.40
codegen_flags: <defaults>
</compile_context>

<pallas_src>
import functools

import jax
import jax.numpy as jnp
from jax.experimental import pallas as pl
from jax.experimental.pallas import tpu as pltpu

HIDDEN = 32            # config['hidden_size']
VOCAB = 20             # config['vocab_size'] -> embedding table has VOCAB+1 rows
EMB_ROWS = VOCAB + 1
EMB_ROWS_PAD = 32      # pad table rows to a lane-friendly 32 (rows 21..31 unused)
MAX_LEN = 8            # config['max_length']
BATCH = 2
MARGIN = 1.0
EPS = 1e-6             # torch pairwise_distance default eps (added to x1 - x2)
ROW_BLOCK_MAX = 256    # sentence-rows per grid block once the batch is large


def _round_up(x, m):
    return ((x + m - 1) // m) * m


def _pick_row_block(n_rows):
    # Whole (small) batch in one block; 256-row blocks (review: 128-512) at scale.
    return min(_round_up(max(n_rows, 1), 8), ROW_BLOCK_MAX)


# ---------------------------------------------------------------------------
# In-kernel shared compute
# ---------------------------------------------------------------------------
def _encode_rows(ids_col, table, bias, n_rows):
    """One-hot embed+Linear (fused table) -> max over sequence -> + bias.

    ids_col : (MAX_LEN * n_rows, 1) int32, position-major flat token ids
              (row p*n_rows + r holds token p of sentence-row r).
    table   : (EMB_ROWS_PAD, H) bf16 fused `emb @ W^T` (row 0 == 0, padding_idx).
    bias    : (1, H) f32 Linear bias (added once, after the pool).
    returns : (n_rows, H) f32 per-row encodings.
    """
    n = ids_col.shape[0]
    v = table.shape[0]
    max_len = n // n_rows
    # Embedding gather + Linear as ONE one-hot MXU matmul (bf16 x bf16 -> f32).
    one_hot = (ids_col == jax.lax.broadcasted_iota(jnp.int32, (n, v), 1)
               ).astype(table.dtype)
    y = jnp.dot(one_hot, table, preferred_element_type=jnp.float32)      # (n, H)
    # max_pool1d over the sequence: max over MAX_LEN sublane-aligned row chunks.
    enc = y[0:n_rows]
    for p in range(1, max_len):
        enc = jnp.maximum(enc, y[p * n_rows:(p + 1) * n_rows])
    return enc + bias                                                    # (n_rows, H)


# ---------------------------------------------------------------------------
# Kernels
# ---------------------------------------------------------------------------
def _encoder_kernel(ids_ref, table_ref, b_ref, out_ref):
    """SentenceEncoder.forward for one block of sentence-rows."""
    rb = out_ref.shape[0]
    out_ref[...] = _encode_rows(ids_ref[...], table_ref[...], b_ref[...], rb)


def _siamese_kernel(ids_ref, table_ref, b_ref, loss_ref, *, batch):
    """Fused siamese forward: 3x encoder + TripletMarginLoss(margin=1, p=2)."""
    n_rows = ids_ref.shape[0] // MAX_LEN
    enc = _encode_rows(ids_ref[...], table_ref[...], b_ref[...], n_rows)
    # Rows are stacked [anchor, anchor, positive, negative]: one aligned
    # half-tile subtract yields anchor-pos in rows [0:B] and anchor-neg in
    # rows [B:2B] (same VPU-halving as the roll trick, no cross-sublane op).
    diff = enc[0:2 * batch] - enc[2 * batch:4 * batch] + EPS             # (2B, H)
    dist = jnp.sqrt(jnp.sum(diff * diff, axis=-1, keepdims=True))        # (2B, 1)
    per_ex = jnp.maximum(dist[0:batch] - dist[batch:2 * batch] + MARGIN, 0.0)
    loss_ref[...] = jnp.sum(per_ex, keepdims=True) * (1.0 / batch)       # mean


# ---------------------------------------------------------------------------
# Wrappers (all layout plumbing lives here, not in-kernel)
# ---------------------------------------------------------------------------
_VMEM = pl.BlockSpec(memory_space=pltpu.MemorySpace.VMEM)


def _ids_to_blocked_column(ids, rb):
    """(R, L) ids -> position-major (nblk*L*rb, 1) column, block-local ordering."""
    r, l = ids.shape
    rows = _round_up(r, rb)
    nblk = rows // rb
    padded = jnp.zeros((rows, l), jnp.int32).at[:r].set(ids.astype(jnp.int32))
    col = padded.reshape(nblk, rb, l).transpose(0, 2, 1).reshape(nblk * l * rb, 1)
    return col, rows, nblk


def sentence_encoder_forward(params, ids):
    """PyTorch SentenceEncoder.forward: ids (B, L) int32 -> (B, H) float32."""
    b, l = ids.shape
    rb = _pick_row_block(b)
    ids_col, rows, nblk = _ids_to_blocked_column(ids, rb)
    out = pl.pallas_call(
        _encoder_kernel,
        out_shape=jax.ShapeDtypeStruct((rows, HIDDEN), jnp.float32),
        grid_spec=pltpu.PrefetchScalarGridSpec(
            num_scalar_prefetch=0,
            grid=(nblk,),
            in_specs=[
                pl.BlockSpec((l * rb, 1), lambda i: (i, 0)),              # ids block
                pl.BlockSpec((EMB_ROWS_PAD, HIDDEN), lambda i: (0, 0)),   # fused table (resident)
                pl.BlockSpec((1, HIDDEN), lambda i: (0, 0)),              # bias (resident)
            ],
            out_specs=pl.BlockSpec((rb, HIDDEN), lambda i: (i, 0)),
        ),
        compiler_params=pltpu.CompilerParams(
            dimension_semantics=("parallel",)),   # shards blocks across v7x's 2 TCs
    )(ids_col, params["table"], params["b"])
    return out[:b]


def siamese_forward(params, sentence1, sentence2=None, sentence3=None):
    """Single sentence -> encoding; triplet -> scalar TripletMarginLoss (mean)."""
    if sentence2 is None or sentence3 is None:
        return sentence_encoder_forward(params, sentence1)
    b, _ = sentence1.shape
    # Stack [anchor, anchor, positive, negative]; 4*B rows, sublane padded.
    ids_all = jnp.concatenate([sentence1, sentence1, sentence2, sentence3], axis=0)
    rows_pad = _round_up(4 * b, 8)
    ids_col, _, _ = _ids_to_blocked_column(ids_all, rows_pad)   # single block
    loss = pl.pallas_call(
        functools.partial(_siamese_kernel, batch=b),
        out_shape=jax.ShapeDtypeStruct((1, 1), jnp.float32),
        in_specs=[_VMEM, _VMEM, _VMEM],
        out_specs=_VMEM,
    )(ids_col, params["table"], params["b"])
    return loss[0, 0]


# ---------------------------------------------------------------------------
# Params + pure-JAX reference (original, unfused f32 semantics)
# ---------------------------------------------------------------------------
def init_params(key):
    k_emb, k_w, k_b = jax.random.split(key, 3)
    emb = jnp.zeros((EMB_ROWS_PAD, HIDDEN), dtype=jnp.float32)
    emb = emb.at[1:EMB_ROWS].set(
        0.1 * jax.random.normal(k_emb, (EMB_ROWS - 1, HIDDEN), dtype=jnp.float32)
    )  # row 0 stays zero (padding_idx=0); rows >= EMB_ROWS are never indexed
    w = 0.1 * jax.random.normal(k_w, (HIDDEN, HIDDEN), dtype=jnp.float32)   # (out, in)
    b = 0.1 * jax.random.normal(k_b, (HIDDEN,), dtype=jnp.float32)
    w_t = jnp.transpose(w)
    # Fold the Linear into the embedding table once; store bf16 for the MXU.
    table = (emb @ w_t).astype(jnp.bfloat16)
    # TODO(synk): nn.Dropout(0.5) is declared in the module but never used in forward.
    return {"emb": emb, "w_t": w_t, "b": b.reshape(1, HIDDEN), "table": table}


def _reference_encode(params, ids):
    e = jnp.take(params["emb"], ids, axis=0)                 # (B, L, H)
    y = e @ params["w_t"] + params["b"]                      # Linear
    return jnp.max(y, axis=1)                                # max_pool1d over seq


def _reference_triplet(params, s1, s2, s3):
    v1, v2, v3 = (_reference_encode(params, s) for s in (s1, s2, s3))
    d_pos = jnp.sqrt(jnp.sum((v1 - v2 + EPS) ** 2, axis=-1))
    d_neg = jnp.sqrt(jnp.sum((v1 - v3 + EPS) ** 2, axis=-1))
    return jnp.mean(jnp.maximum(d_pos - d_neg + MARGIN, 0.0))


# ---------------------------------------------------------------------------
# Demo / self-check
# ---------------------------------------------------------------------------
if __name__ == "__main__":
    key = jax.random.PRNGKey(0)
    k_params, k1, k2, k3, k_big = jax.random.split(key, 5)
    params = init_params(k_params)

    # Token ids in [1, VOCAB]; tail of each sentence padded with 0 (padding_idx).
    def make_sentences(k, n):
        ids = jax.random.randint(k, (n, MAX_LEN), 1, VOCAB + 1, dtype=jnp.int32)
        return ids.at[:, -2:].set(0)

    s1 = make_sentences(k1, BATCH)
    s2 = make_sentences(k2, BATCH)
    s3 = make_sentences(k3, BATCH)

    encode = jax.jit(sentence_encoder_forward)
    triplet = jax.jit(siamese_forward)

    # 1) SentenceEncoder.forward at the spec size: (2, 8) ids -> (2, 32).
    enc = jax.block_until_ready(encode(params, s1))
    ref_enc = _reference_encode(params, s1)
    assert enc.shape == (BATCH, HIDDEN)
    assert jnp.allclose(enc, ref_enc, atol=2e-3, rtol=2e-3), (enc, ref_enc)

    # 2) Batched path: 300 sentences in ONE pallas_call (2 parallel grid blocks).
    big = make_sentences(k_big, 300)
    enc_big = jax.block_until_ready(encode(params, big))
    ref_big = _reference_encode(params, big)
    assert enc_big.shape == (300, HIDDEN)
    assert jnp.allclose(enc_big, ref_big, atol=2e-3, rtol=2e-3)

    # 3) Fully fused siamese / triplet-loss branch (single pallas_call).
    loss = jax.block_until_ready(triplet(params, s1, s2, s3))
    ref_loss = _reference_triplet(params, s1, s2, s3)
    assert jnp.allclose(loss, ref_loss, atol=2e-2, rtol=2e-2), (loss, ref_loss)

    print("KERNEL_OK")
</pallas_src>

<mosaic_0001>
module attributes {stable_mosaic.version = 11 : i64} {
  func.func @_encoder_kernel(%arg0: i32, %arg1: memref<64x1xi32, #tpu.memory_space<vmem>>, %arg2: memref<32x32xbf16, #tpu.memory_space<vmem>>, %arg3: memref<1x32xf32, #tpu.memory_space<vmem>>, %arg4: memref<8x32xf32, #tpu.memory_space<vmem>>) attributes {dimension_semantics = [#tpu.dimension_semantics<parallel>], iteration_bounds = array<i64: 1>, scalar_prefetch = 0 : i64, scratch_operands = 0 : i64, tpu.core_type = #tpu.core_type<tc>, window_params = [{transform_indices = @transform_0, window_bounds = array<i64: 64, 1>}, {pipeline_mode = #tpu.pipeline_mode<synchronous>, transform_indices = @transform_1, window_bounds = array<i64: 32, 32>}, {pipeline_mode = #tpu.pipeline_mode<synchronous>, transform_indices = @transform_2, window_bounds = array<i64: 1, 32>}, {transform_indices = @transform_3, window_bounds = array<i64: 8, 32>}]} {
    %c0 = arith.constant 0 : index
    %c0_0 = arith.constant 0 : index
    %0 = vector.load %arg1[%c0, %c0_0] : memref<64x1xi32, #tpu.memory_space<vmem>>, vector<64x1xi32>
    %c0_1 = arith.constant 0 : index
    %c0_2 = arith.constant 0 : index
    %1 = vector.load %arg2[%c0_1, %c0_2] : memref<32x32xbf16, #tpu.memory_space<vmem>>, vector<32x32xbf16>
    %c0_3 = arith.constant 0 : index
    %c0_4 = arith.constant 0 : index
    %2 = vector.load %arg3[%c0_3, %c0_4] : memref<1x32xf32, #tpu.memory_space<vmem>>, vector<1x32xf32>
    %3 = tpu.iota {dimensions = array<i32: 1>} : vector<64x32xi32>
    %4 = vector.broadcast %0 : vector<64x1xi32> to vector<64x32xi32>
    %5 = arith.cmpi eq, %4, %3 : vector<64x32xi32>
    %6 = arith.extui %5 : vector<64x32xi1> to vector<64x32xi32>
    %7 = arith.sitofp %6 : vector<64x32xi32> to vector<64x32xf32>
    %8 = arith.truncf %7 : vector<64x32xf32> to vector<64x32xbf16>
    %cst = arith.constant dense<0.000000e+00> : vector<64x32xf32>
    %9 = tpu.matmul %8, %1, %cst {dimension_numbers = #tpu.dot_dimension_numbers<[1], [0], [0], [1], [0, 0, 1, 1], [], []>} : vector<64x32xbf16>, vector<32x32xbf16>, vector<64x32xf32> -> vector<64x32xf32>
    %10 = vector.extract_strided_slice %9 {offsets = [0, 0], sizes = [8, 32], strides = [1, 1]} : vector<64x32xf32> to vector<8x32xf32>
    %11 = vector.extract_strided_slice %9 {offsets = [8, 0], sizes = [8, 32], strides = [1, 1]} : vector<64x32xf32> to vector<8x32xf32>
    %12 = arith.maximumf %10, %11 : vector<8x32xf32>
    %13 = vector.extract_strided_slice %9 {offsets = [16, 0], sizes = [8, 32], strides = [1, 1]} : vector<64x32xf32> to vector<8x32xf32>
    %14 = arith.maximumf %12, %13 : vector<8x32xf32>
    %15 = vector.extract_strided_slice %9 {offsets = [24, 0], sizes = [8, 32], strides = [1, 1]} : vector<64x32xf32> to vector<8x32xf32>
    %16 = arith.maximumf %14, %15 : vector<8x32xf32>
    %17 = vector.extract_strided_slice %9 {offsets = [32, 0], sizes = [8, 32], strides = [1, 1]} : vector<64x32xf32> to vector<8x32xf32>
    %18 = arith.maximumf %16, %17 : vector<8x32xf32>
    %19 = vector.extract_strided_slice %9 {offsets = [40, 0], sizes = [8, 32], strides = [1, 1]} : vector<64x32xf32> to vector<8x32xf32>
    %20 = arith.maximumf %18, %19 : vector<8x32xf32>
    %21 = vector.extract_strided_slice %9 {offsets = [48, 0], sizes = [8, 32], strides = [1, 1]} : vector<64x32xf32> to vector<8x32xf32>
    %22 = arith.maximumf %20, %21 : vector<8x32xf32>
    %23 = vector.extract_strided_slice %9 {offsets = [56, 0], sizes = [8, 32], strides = [1, 1]} : vector<64x32xf32> to vector<8x32xf32>
    %24 = arith.maximumf %22, %23 : vector<8x32xf32>
    %25 = vector.broadcast %2 : vector<1x32xf32> to vector<8x32xf32>
    %26 = arith.addf %24, %25 : vector<8x32xf32>
    %c0_5 = arith.constant 0 : index
    %c0_6 = arith.constant 0 : index
    %27 = vector.load %arg4[%c0_5, %c0_6] : memref<8x32xf32, #tpu.memory_space<vmem>>, vector<8x32xf32>
    tpu.vector_store %arg4[%c0_5, %c0_6], %26 {strides = array<i32>} : memref<8x32xf32, #tpu.memory_space<vmem>>, vector<8x32xf32>,
    return
  }
  func.func @transform_0(%arg0: i32) -> (i32, i32) {
    %c0_i32 = arith.constant 0 : i32
    %c0_i32_0 = arith.constant 0 : i32
    return %arg0, %c0_i32 : i32, i32
  }
  func.func @transform_1(%arg0: i32) -> (i32, i32) {
    %c0_i32 = arith.constant 0 : i32
    %c0_i32_0 = arith.constant 0 : i32
    %c0_i32_1 = arith.constant 0 : i32
    return %c0_i32, %c0_i32_0 : i32, i32
  }
  func.func @transform_2(%arg0: i32) -> (i32, i32) {
    %c0_i32 = arith.constant 0 : i32
    %c0_i32_0 = arith.constant 0 : i32
    %c0_i32_1 = arith.constant 0 : i32
    return %c0_i32, %c0_i32_0 : i32, i32
  }
  func.func @transform_3(%arg0: i32) -> (i32, i32) {
    %c0_i32 = arith.constant 0 : i32
    %c0_i32_0 = arith.constant 0 : i32
    return %arg0, %c0_i32 : i32, i32
  }
}

</mosaic_0001>

<bundles_post_ra>
// kernel: sentence_encoder_forward.1
= control target key start
LH: loop header
LB: loop body
LE: loop exit
PB: predicated region body
PF: predicated region fallthrough
CT: control target
= control target key end

     0   :  { %v234_v0 = vmov 0   ;;  %v28_v11 = vlaneseq  ;;  %vm94_vm4 = vcmask 261120   ;;  %v235_v17 = vmov 0.0   ;;  %s297_s0 = inlined_call_operand.vmem [shape: s32[64,1], index: 0, kind: input, shape index: {}]   ;;  %s298_s1 = inlined_call_operand.vmem [shape: bf16[32,32], index: 1, kind: input, shape index: {}]   ;;  %s299_s2 = inlined_call_operand.vmem [shape: f32[1,32], index: 2, kind: input, shape index: {}]   ;;  %s300_s3 = inlined_call_operand.vmem [shape: f32[8,32], index: 3, kind: output, shape index: {}]  }
   0x1   :  { %231 = vset.pattern.permute.xlu1 %v234_v0  ;;  %230 = vset.pattern.permute.xlu0 %v234_v0  ;;  %v17_v1 = vld [vmem:[%s297_s0 + $0x10] sm:$0xff]  ;;  %v15_v2 = vld [vmem:[%s297_s0] sm:$0xff]  ;;  %v18_v3 = vld [vmem:[%s297_s0 + $0x18] sm:$0xff] }
   0x2   :  { %37 = vperm.xlu1 %231, %v17_v1   ;;  %31 = vperm.xlu0 %230, %v15_v2   ;;  %v16_v4 = vld [vmem:[%s297_s0 + $0x8] sm:$0xff]  ;;  %v233_v6 = vld [vmem:[%s298_s1] sm:$0xff]   ;;  %v22_v9 = vld [vmem:[%s297_s0 + $0x38] sm:$0xff]  ;;  %v29_v12 = vand.u32 127, %v28_v11 }
   0x3   :  { %v232_v5 = vld [vmem:[%s298_s1 + $0x8] sm:$0xff]   ;;  %v19_v8 = vld [vmem:[%s297_s0 + $0x20] sm:$0xff]  ;;  %v21_v10 = vld [vmem:[%s297_s0 + $0x30] sm:$0xff] }
   0x4   :  { %v20_v7 = vld [vmem:[%s297_s0 + $0x28] sm:$0xff]  ;;  %212 = vmatprep.subr.bf16.mxu0 %v232_v5  ;;  %224 = vmatprep.subr.bf16.mxu1 %v232_v5  ;;  %v205_v48 = vld [vmem:[%s299_s2] ss:$0 sm:$0xff] }
   0x5   :  { %213 = vmatpush3.bf16.msra.mxu0 %v232_v5  ;;  %226 = vmatpush3.bf16.msra.mxu1 %v232_v5 }
   0x6   :  { %40 = vperm.xlu1 %231, %v18_v3   ;;  %34 = vperm.xlu0 %230, %v16_v4  }
   0x7   :  { %214 = vmatprep.subr.bf16.mxu0 %v233_v6  ;;  %225 = vmatprep.subr.bf16.mxu1 %v233_v6 }
   0x9   :  { %215 = vmatpush3.bf16.msra.mxu0 %v233_v6  ;;  %227 = vmatpush3.bf16.msra.mxu1 %v233_v6 }
   0xa   :  { %46 = vperm.xlu1 %231, %v20_v7   ;;  %43 = vperm.xlu0 %230, %v19_v8  }
   0xe   :  { %52 = vperm.xlu1 %231, %v22_v9   ;;  %49 = vperm.xlu0 %230, %v21_v10  }
  0x7d   :  { %v38_v13 = vpop.permute.xlu1 %37  ;;  %v32_v14 = vpop.permute.xlu0 %31 }
  0x7e   :  { %vm56_vm0 = vcmp.eq.s32.totalorder %v38_v13, %v29_v12  ;;  %vm54_vm1 = vcmp.eq.s32.totalorder %v32_v14, %v29_v12 }
  0x7f   :  { %v193_v18 = vsel %vm56_vm0, 1.0, %v235_v17  ;;  %v191_v19 = vsel %vm54_vm1, 1.0, %v235_v17 }
  0x81   :  { %v41_v15 = vpop.permute.xlu1 %40  ;;  %v35_v16 = vpop.permute.xlu0 %34 }
  0x82   :  { %vm57_vm2 = vcmp.eq.s32.totalorder %v41_v15, %v29_v12  ;;  %vm55_vm3 = vcmp.eq.s32.totalorder %v35_v16, %v29_v12 }
  0x83   :  { %v194_v20 = vsel %vm57_vm2, 1.0, %v235_v17  ;;  %v192_v21 = vsel %vm55_vm3, 1.0, %v235_v17 }
  0x84   :  { %v79_v22 = vpack.c.bf16 %v194_v20, %v193_v18  ;;  %v78_v23 = vpack.c.bf16 %v192_v21, %v191_v19 }
  0x85   :  { %v47_v24 = vpop.permute.xlu1 %46  ;;  %v44_v25 = vpop.permute.xlu0 %43 }
  0x86   :  { %vm59_vm5 = vcmp.eq.s32.totalorder %v47_v24, %v29_v12  ;;  %vm58_vm6 = vcmp.eq.s32.totalorder %v44_v25, %v29_v12  ;;  %216 = vmatprep.mubr.msk.bf16.mxu0 %vm94_vm4, %v78_v23 }
  0x87   :  { %v196_v26 = vsel %vm59_vm5, 1.0, %v235_v17  ;;  %v195_v27 = vsel %vm58_vm6, 1.0, %v235_v17  ;;  %217 = vmatmul.mubr.msk.bf16.vlgmr.msra.gmra.mxu0 %vm94_vm4, %v79_v22 }
  0x88   :  { %v80_v28 = vpack.c.bf16 %v196_v26, %v195_v27 }
  0x89   :  { %v53_v29 = vpop.permute.xlu1 %52  ;;  %v50_v30 = vpop.permute.xlu0 %49 }
  0x8a   :  { %vm61_vm7 = vcmp.eq.s32.totalorder %v53_v29, %v29_v12  ;;  %vm60_vm8 = vcmp.eq.s32.totalorder %v50_v30, %v29_v12  ;;  %220 = vmatprep.mubr.msk.bf16.mxu1 %vm94_vm4, %v80_v28 }
  0x8b   :  { %v198_v31 = vsel %vm61_vm7, 1.0, %v235_v17  ;;  %v197_v32 = vsel %vm60_vm8, 1.0, %v235_v17 }
  0x8c   :  { %v81_v33 = vpack.c.bf16 %v198_v31, %v197_v32 }
  0x8e   :  { %221 = vmatmul.mubr.msk.bf16.vlgmr.msra.gmra.mxu1 %vm94_vm4, %v81_v33 }
 0x147   :  { %v218_v34 = vpop.f32.mrf.mxu0 }
 0x149   :  { %v141_v35 = vpop.f32.mrf.mxu0 }
 0x14b   :  { %v219_v36 = vpop.f32.mrf.mxu0 }
 0x14d   :  { %v144_v37 = vpop.f32.mrf.mxu0 }
 0x14e   :  { %v172_v38 = vmax.f32 %v141_v35, %v144_v37  ;;  %v222_v39 = vpop.f32.mrf.mxu1 }
 0x150   :  { %v173_v40 = vmax.f32 %v172_v38, %v218_v34  ;;  %v157_v41 = vpop.f32.mrf.mxu1 }
 0x152   :  { %v174_v42 = vmax.f32 %v173_v40, %v219_v36  ;;  %v223_v43 = vpop.f32.mrf.mxu1 }
 0x154   :  { %v175_v44 = vmax.f32 %v174_v42, %v157_v41  ;;  %v160_v45 = vpop.f32.mrf.mxu1 }
 0x156   :  { %v176_v46 = vmax.f32 %v175_v44, %v160_v45 }
 0x158   :  { %v177_v47 = vmax.f32 %v176_v46, %v222_v39 }
 0x15a   :  { %v178_v49 = vmax.f32 %v177_v47, %v223_v43 }
 0x15c   :  { %v185_v50 = vadd.f32 %v205_v48, %v178_v49 }
 0x15e   :  { %186 = vst.msk [vmem:[%s300_s3] sm:$0xff] %vm94_vm4, %v185_v50 }

</bundles_post_ra>
